<compile_context>
chip_gen: v5e
topology: v5e:2x2
jax: 0.10.0
libtpu: 0.0.40
codegen_flags: <defaults>
</compile_context>

<pallas_src>
import functools
import math

import jax
import jax.numpy as jnp
from jax.experimental import pallas as pl
from jax.experimental.pallas import tpu as pltpu


def _abs_mean_mid_kernel(x_ref, o_ref, acc_ref, *, reduce_size, r_chunk, needs_mask):
    """Reduce axis 1 of a (tile_p, r_chunk, tile_t) block into (tile_p, tile_t)."""
    r_idx = pl.program_id(2)
    last_r = pl.num_programs(2) - 1

    @pl.when(r_idx == 0)
    def _init():
        acc_ref[...] = jnp.zeros_like(acc_ref)

    # TODO(synk): for bf16 inputs on v6e/v7x the sublane sum + upcast could be
    # pushed onto the MXU (ones-vector dot) to keep the kernel HBM-bound; kept
    # on the VPU here for robustness across chips/dtypes.
    x = jnp.abs(x_ref[...].astype(jnp.float32))

    if needs_mask:
        # Only the final (partial) R chunk pays for iota/compare/select.
        @pl.when(r_idx != last_r)
        def _full_chunk():
            acc_ref[...] += jnp.sum(x, axis=1)

        @pl.when(r_idx == last_r)
        def _partial_chunk():
            row = jax.lax.broadcasted_iota(jnp.int32, x.shape, 1) + r_idx * r_chunk
            acc_ref[...] += jnp.sum(jnp.where(row < reduce_size, x, 0.0), axis=1)
    else:
        acc_ref[...] += jnp.sum(x, axis=1)

    @pl.when(r_idx == last_r)
    def _finalize():
        o_ref[...] = (acc_ref[...] * (1.0 / reduce_size)).astype(o_ref.dtype)


def _abs_mean_last_kernel(x_ref, o_ref, acc_ref, *, reduce_size, r_chunk, needs_mask):
    """Reduce the lane axis of a (tile_p, r_chunk) block into (tile_p, 1)."""
    r_idx = pl.program_id(1)
    last_r = pl.num_programs(1) - 1

    @pl.when(r_idx == 0)
    def _init():
        acc_ref[...] = jnp.zeros_like(acc_ref)

    x = jnp.abs(x_ref[...].astype(jnp.float32))

    if needs_mask:
        @pl.when(r_idx != last_r)
        def _full_chunk():
            acc_ref[...] += jnp.sum(x, axis=1, keepdims=True)

        @pl.when(r_idx == last_r)
        def _partial_chunk():
            col = jax.lax.broadcasted_iota(jnp.int32, x.shape, 1) + r_idx * r_chunk
            acc_ref[...] += jnp.sum(jnp.where(col < reduce_size, x, 0.0),
                                    axis=1, keepdims=True)
    else:
        acc_ref[...] += jnp.sum(x, axis=1, keepdims=True)

    @pl.when(r_idx == last_r)
    def _finalize():
        o_ref[...] = (acc_ref[...] * (1.0 / reduce_size)).astype(o_ref.dtype)


def _vmem_budgets():
    """(target input-block bytes, vmem_limit_bytes) sized per TPU generation."""
    try:
        cap = getattr(pltpu.get_tpu_info(), "vmem_capacity_bytes", None)
    except Exception:
        cap = None
    if cap is not None and cap >= 128 * 1024 * 1024:
        # v5e / v6e: 128 MiB physical VMEM -> bigger blocks, bigger limit.
        return 8 * 1024 * 1024, 96 * 1024 * 1024
    # v7x (64 MiB physical VMEM) or unknown: stay conservative.
    return 4 * 1024 * 1024, 40 * 1024 * 1024


def norm_reducer(x, dim, *, tile_lanes_max=1024, target_block_bytes=None,
                 vmem_limit_bytes=None):
    """Equivalent of torch: x.abs().mean(dim)."""
    dim = dim % x.ndim
    shape = x.shape
    P = math.prod(shape[:dim])
    R = shape[dim]
    T = math.prod(shape[dim + 1:])
    out_nd_shape = shape[:dim] + shape[dim + 1:]

    default_target, default_limit = _vmem_budgets()
    if target_block_bytes is None:
        target_block_bytes = default_target
    if vmem_limit_bytes is None:
        vmem_limit_bytes = default_limit

    itemsize = jnp.dtype(x.dtype).itemsize
    sublane = max(8, 32 // itemsize)                # 8 f32, 16 bf16, 32 int8/fp8
    lane_tile_max = max(128, (tile_lanes_max // 128) * 128)
    total_bytes = P * R * T * itemsize

    if T == 1:
        # ---- last-axis reduction: (P, R) slab, reduce along the lane axis ----
        x2 = x.reshape(P, R)
        tile_r = R if R <= lane_tile_max else lane_tile_max
        row_bytes = max(tile_r * itemsize, 1)
        cap_p = max(1, target_block_bytes // row_bytes)
        if P <= cap_p:
            tile_p = P
        else:
            tile_p = min(P, max(8, (cap_p // 8) * 8))
        # Megacore: keep >= 2 parallel tiles when there is enough work.
        if (pl.cdiv(P, tile_p) == 1 and P >= 16
                and total_bytes >= 2 * 1024 * 1024):
            tile_p = min(P, max(8, (pl.cdiv(P, 2) // 8) * 8))
        num_r = pl.cdiv(R, tile_r)
        needs_mask = (R % tile_r) != 0
        grid = (pl.cdiv(P, tile_p), num_r)

        out = pl.pallas_call(
            functools.partial(_abs_mean_last_kernel, reduce_size=R,
                              r_chunk=tile_r, needs_mask=needs_mask),
            out_shape=jax.ShapeDtypeStruct((P, 1), x.dtype),
            grid_spec=pltpu.PrefetchScalarGridSpec(
                num_scalar_prefetch=0,
                grid=grid,
                in_specs=[pl.BlockSpec((tile_p, tile_r), lambda p, r: (p, r))],
                out_specs=pl.BlockSpec((tile_p, 1), lambda p, r: (p, 0)),
                scratch_shapes=[pltpu.VMEM((tile_p, 1), jnp.float32)]),
            compiler_params=pltpu.CompilerParams(
                dimension_semantics=("parallel", "arbitrary"),
                vmem_limit_bytes=vmem_limit_bytes),
        )(x2)
        return out.reshape(out_nd_shape)

    # ---- general case: (P, R, T) slab, reduce the sublane (middle) axis ----
    x3 = x.reshape(P, R, T)
    tile_t = T if T <= lane_tile_max else lane_tile_max
    row_bytes = max(tile_t * itemsize, 1)

    if R * row_bytes <= target_block_bytes:
        r_chunk = R
    else:
        r_chunk = min(R, max(sublane,
                             ((target_block_bytes // row_bytes) // sublane) * sublane))
    num_r = pl.cdiv(R, r_chunk)
    needs_mask = (R % r_chunk) != 0

    block_bytes_per_p = max(r_chunk * row_bytes, 1)
    cap_p = max(1, target_block_bytes // block_bytes_per_p)
    if P <= cap_p:
        tile_p = P
    else:
        tile_p = min(P, max(8, (cap_p // 8) * 8))

    # Megacore: avoid a degenerate 1x1 parallel grid when there is real work.
    if (pl.cdiv(P, tile_p) == 1 and pl.cdiv(T, tile_t) == 1
            and total_bytes >= 2 * 1024 * 1024):
        if P >= 16:
            tile_p = min(P, max(8, (pl.cdiv(P, 2) // 8) * 8))
        elif T >= 256:
            tile_t = max(128, ((pl.cdiv(T, 2) + 127) // 128) * 128)

    grid = (pl.cdiv(P, tile_p), pl.cdiv(T, tile_t), num_r)

    out = pl.pallas_call(
        functools.partial(_abs_mean_mid_kernel, reduce_size=R,
                          r_chunk=r_chunk, needs_mask=needs_mask),
        out_shape=jax.ShapeDtypeStruct((P, T), x.dtype),
        grid_spec=pltpu.PrefetchScalarGridSpec(
            num_scalar_prefetch=0,
            grid=grid,
            in_specs=[pl.BlockSpec((tile_p, r_chunk, tile_t),
                                   lambda p, t, r: (p, r, t))],
            out_specs=pl.BlockSpec((tile_p, tile_t), lambda p, t, r: (p, t)),
            scratch_shapes=[pltpu.VMEM((tile_p, tile_t), jnp.float32)]),
        compiler_params=pltpu.CompilerParams(
            dimension_semantics=("parallel", "parallel", "arbitrary"),
            vmem_limit_bytes=vmem_limit_bytes),
    )(x3)
    return out.reshape(out_nd_shape)


if __name__ == "__main__":
    key = jax.random.PRNGKey(0)
    k1, k2, k3, k4 = jax.random.split(key, 4)

    # 1) NCHW input, reduce over channel dim (NormReducer(dim=1)).
    x = jax.random.normal(k1, (2, 4, 16, 16), dtype=jnp.float32)
    y = jax.block_until_ready(norm_reducer(x, 1))
    y_ref = jnp.mean(jnp.abs(x), axis=1)
    assert y.shape == y_ref.shape, (y.shape, y_ref.shape)
    assert jnp.allclose(y, y_ref, atol=1e-6, rtol=1e-6)

    # 2) Partial lane tiles + chunked/masked reduction axis (dim=0).
    x2 = jax.random.normal(k2, (20, 3, 50), dtype=jnp.float32)
    y2 = jax.block_until_ready(
        norm_reducer(x2, 0, tile_lanes_max=128, target_block_bytes=1536))
    y2_ref = jnp.mean(jnp.abs(x2), axis=0)
    assert y2.shape == y2_ref.shape, (y2.shape, y2_ref.shape)
    assert jnp.allclose(y2, y2_ref, atol=1e-5, rtol=1e-5)

    # 3) P folded into the block: multiple P tiles plus a partial P edge block.
    x3 = jax.random.normal(k3, (20, 5, 3, 10), dtype=jnp.float32)
    y3 = jax.block_until_ready(norm_reducer(x3, 1, target_block_bytes=1200))
    y3_ref = jnp.mean(jnp.abs(x3), axis=1)
    assert y3.shape == y3_ref.shape, (y3.shape, y3_ref.shape)
    assert jnp.allclose(y3, y3_ref, atol=1e-5, rtol=1e-5)

    # 4) Last-axis reduction path with a chunked/masked lane reduction.
    x4 = jax.random.normal(k4, (16, 300), dtype=jnp.float32)
    y4 = jax.block_until_ready(norm_reducer(x4, -1, tile_lanes_max=128))
    y4_ref = jnp.mean(jnp.abs(x4), axis=-1)
    assert y4.shape == y4_ref.shape, (y4.shape, y4_ref.shape)
    assert jnp.allclose(y4, y4_ref, atol=1e-5, rtol=1e-5)

    print("KERNEL_OK")
</pallas_src>

<mosaic_0001>
module attributes {stable_mosaic.version = 11 : i64} {
  func.func @_abs_mean_mid_kernel(%arg0: i32, %arg1: i32, %arg2: i32, %arg3: memref<2x4x256xf32, #tpu.memory_space<vmem>>, %arg4: memref<2x256xf32, #tpu.memory_space<vmem>>, %arg5: memref<2x256xf32, #tpu.memory_space<vmem>>) attributes {dimension_semantics = [#tpu.dimension_semantics<parallel>, #tpu.dimension_semantics<parallel>, #tpu.dimension_semantics<arbitrary>], iteration_bounds = array<i64: 1, 1, 1>, scalar_prefetch = 0 : i64, scratch_operands = 1 : i64, tpu.core_type = #tpu.core_type<tc>, window_params = [{transform_indices = @transform_0, window_bounds = array<i64: 2, 4, 256>}, {transform_indices = @transform_1, window_bounds = array<i64: 2, 256>}]} {
    %c0_i32 = arith.constant 0 : i32
    %0 = arith.cmpi eq, %arg2, %c0_i32 : i32
    %1 = arith.extui %0 : i1 to i32
    %c0_i32_0 = arith.constant 0 : i32
    %2 = arith.cmpi ne, %1, %c0_i32_0 : i32
    scf.if %2 {
      %cst_9 = arith.constant 0.000000e+00 : f32
      %12 = vector.broadcast %cst_9 : f32 to vector<2x256xf32>
      %c0_10 = arith.constant 0 : index
      %c0_11 = arith.constant 0 : index
      %13 = vector.load %arg5[%c0_10, %c0_11] : memref<2x256xf32, #tpu.memory_space<vmem>>, vector<2x256xf32>
      tpu.vector_store %arg5[%c0_10, %c0_11], %12 {strides = array<i32>} : memref<2x256xf32, #tpu.memory_space<vmem>>, vector<2x256xf32>,
    } else {
    }
    %c0 = arith.constant 0 : index
    %c0_1 = arith.constant 0 : index
    %c0_2 = arith.constant 0 : index
    %3 = vector.load %arg3[%c0, %c0_1, %c0_2] : memref<2x4x256xf32, #tpu.memory_space<vmem>>, vector<2x4x256xf32>
    %4 = math.absf %3 : vector<2x4x256xf32>
    %c0_3 = arith.constant 0 : index
    %c0_4 = arith.constant 0 : index
    %5 = vector.load %arg5[%c0_3, %c0_4] : memref<2x256xf32, #tpu.memory_space<vmem>>, vector<2x256xf32>
    %cst = arith.constant dense<0.000000e+00> : vector<2x256xf32>
    %6 = vector.multi_reduction <add>, %4, %cst [1] : vector<2x4x256xf32> to vector<2x256xf32>
    %7 = arith.addf %5, %6 : vector<2x256xf32>
    %c0_5 = arith.constant 0 : index
    %c0_6 = arith.constant 0 : index
    %8 = vector.load %arg5[%c0_5, %c0_6] : memref<2x256xf32, #tpu.memory_space<vmem>>, vector<2x256xf32>
    tpu.vector_store %arg5[%c0_5, %c0_6], %7 {strides = array<i32>} : memref<2x256xf32, #tpu.memory_space<vmem>>, vector<2x256xf32>,
    %c0_i32_7 = arith.constant 0 : i32
    %9 = arith.cmpi eq, %arg2, %c0_i32_7 : i32
    %10 = arith.extui %9 : i1 to i32
    %c0_i32_8 = arith.constant 0 : i32
    %11 = arith.cmpi ne, %10, %c0_i32_8 : i32
    scf.if %11 {
      %c0_9 = arith.constant 0 : index
      %c0_10 = arith.constant 0 : index
      %12 = vector.load %arg5[%c0_9, %c0_10] : memref<2x256xf32, #tpu.memory_space<vmem>>, vector<2x256xf32>
      %cst_11 = arith.constant 2.500000e-01 : f32
      %13 = vector.broadcast %cst_11 : f32 to vector<2x256xf32>
      %14 = arith.mulf %12, %13 : vector<2x256xf32>
      %c0_12 = arith.constant 0 : index
      %c0_13 = arith.constant 0 : index
      %15 = vector.load %arg4[%c0_12, %c0_13] : memref<2x256xf32, #tpu.memory_space<vmem>>, vector<2x256xf32>
      tpu.vector_store %arg4[%c0_12, %c0_13], %14 {strides = array<i32>} : memref<2x256xf32, #tpu.memory_space<vmem>>, vector<2x256xf32>,
    } else {
    }
    return
  }
  func.func @transform_0(%arg0: i32, %arg1: i32, %arg2: i32) -> (i32, i32, i32) {
    %c0_i32 = arith.constant 0 : i32
    return %arg0, %arg2, %arg1 : i32, i32, i32
  }
  func.func @transform_1(%arg0: i32, %arg1: i32, %arg2: i32) -> (i32, i32) {
    %c0_i32 = arith.constant 0 : i32
    return %arg0, %arg1 : i32, i32
  }
}

</mosaic_0001>

<bundles_post_ra>
// kernel: tpu_custom_call.1
= control target key start
LH: loop header
LB: loop body
LE: loop exit
PB: predicated region body
PF: predicated region fallthrough
CT: control target
= control target key end

     0   :  { %6 = vsyncpa [#allocation4], 0  ;;  %s203_s0 = inlined_call_operand.hbm [shape: f32[2,4,256], index: 0, kind: input, shape index: {}]   ;;  %s204_s1 = inlined_call_operand.hbm [shape: f32[2,256], index: 1, kind: output, shape index: {}]  }
   0x1   :  { %7 = vsyncpa [#allocation5], 0  ;;  %s12_s8 = sshll.u32 %s203_s0, 4  ;;  %s182_s9 = smov [#allocation3]   ;;  %s13_s8 = int_to_ptr.hbm [resolvable:$true] %s12_s8 }
   0x2   :  { %s14_s10 = sshll.u32 %s182_s9, 4  ;;  %s183_s11 = smov 128   ;;  %s15_s10 = int_to_ptr.vmem [resolvable:$true] %s14_s10 }
   0x3   :  { %s184_s12 = smov 8  }
   0x4   :  { %20 = dma.hbm_to_vmem [thread:$0]  %s13_s8, 256, %s15_s10, [#allocation4], %s183_s11, %s183_s11, %s184_s12  }
   0x5   :  { %178 = dma.done.wait [#allocation4], 256  }
   0x6   :  { %179 = vsyncadd [#allocation4], 4294967040  ;;  %v185_v0 = vmov 0.0   ;;  %v30_v1 = vld [vmem:[#allocation3] sm:$0xff]  ;;  %v31_v2 = vld [vmem:[#allocation3 + $0x8] sm:$0xff]  ;;  %vm48_vm0 = vcmask 1043456  }
   0x7   :  { %29 = vst [vmem:[#allocation2] sm:$0xf] %v185_v0  ;;  %v32_v3 = vand.u32 2147483647, %v30_v1  ;;  %v33_v4 = vand.u32 2147483647, %v31_v2 }
   0x8   :  { %vm83_vm1 = vcmask 1041408   ;;  %vm91_vm2 = vcmask 1041409   ;;  %vm93_vm3 = vcmask 1043459   ;;  %vm95_vm4 = vcmask 1045509   ;;  %s186_s0 = smov [#allocation6]   ;;  %s115_s16 = sshll.u32 %s204_s1, 4  ;;  %s116_s16 = int_to_ptr.hbm [resolvable:$true] %s115_s16 }
   0x9   :  { %37 = vst [vmem:[#allocation1] ss:$2 sm:$0xff] %v32_v3  ;;  %vm97_vm5 = vcmask 1047559   ;;  %s113_s13 = sshll.u32 %s186_s0, 4  ;;  %s114_s13 = int_to_ptr.vmem [resolvable:$true] %s113_s13 }
   0xa   :  { %41 = vst [vmem:[#allocation1 + $0x10] ss:$2 sm:$0xff] %v33_v4 }
   0xe   :  { %v34_v43 = vld [vmem:[#allocation2] sm:$0xf] }
  0x10   :  { %v38_v5 = vld.sshfl [vmem:[#allocation1] sm:$0xff pattern:$0x75316420]  ;;  %v39_v6 = vld.sshfl [vmem:[#allocation1 + $0x8] sm:$0xff pattern:$0x75316420] }
  0x11   :  { %v42_v7 = vld.sshfl [vmem:[#allocation1 + $0x10] sm:$0xff pattern:$0x75316420]  ;;  %v43_v8 = vld.sshfl [vmem:[#allocation1 + $0x18] sm:$0xff pattern:$0x75316420] }
  0x12   :  { %v49_v9 = vsel %vm48_vm0, %v38_v5, 0.0  ;;  %v56_v10 = vsel %vm48_vm0, %v39_v6, 0.0  ;;  %v63_v11 = vsel %vm48_vm0, %v42_v7, 0.0  ;;  %v70_v12 = vsel %vm48_vm0, %v43_v8, 0.0 }
  0x13   :  { %v50_v13 = vrot.slane %v49_v9, 4  ;;  %v57_v14 = vrot.slane %v56_v10, 4  ;;  %v64_v15 = vrot.slane %v63_v11, 4  ;;  %v71_v16 = vrot.slane %v70_v12, 4 }
  0x15   :  { %v51_v17 = vadd.f32 %v50_v13, %v49_v9  ;;  %v58_v18 = vadd.f32 %v57_v14, %v56_v10  ;;  %v65_v19 = vadd.f32 %v64_v15, %v63_v11  ;;  %v72_v20 = vadd.f32 %v71_v16, %v70_v12 }
  0x17   :  { %v52_v21 = vrot.slane %v51_v17, 2  ;;  %v59_v22 = vrot.slane %v58_v18, 2  ;;  %v66_v23 = vrot.slane %v65_v19, 2  ;;  %v73_v24 = vrot.slane %v72_v20, 2 }
  0x19   :  { %v53_v25 = vadd.f32 %v52_v21, %v51_v17  ;;  %v60_v26 = vadd.f32 %v59_v22, %v58_v18  ;;  %v67_v27 = vadd.f32 %v66_v23, %v65_v19  ;;  %v74_v28 = vadd.f32 %v73_v24, %v72_v20 }
  0x1b   :  { %v61_v29 = vrot.slane %v60_v26, 1  ;;  %v68_v30 = vrot.slane %v67_v27, 1  ;;  %v75_v31 = vrot.slane %v74_v28, 1  ;;  %v54_v32 = vrot.slane %v53_v25, 1 }
  0x1d   :  { %v62_v33 = vadd.f32 %v61_v29, %v60_v26  ;;  %v76_v34 = vadd.f32 %v75_v31, %v74_v28  ;;  %v69_v35 = vadd.f32 %v68_v30, %v67_v27  ;;  %v55_v38 = vadd.f32 %v54_v32, %v53_v25 }
  0x1f   :  { %v81_v36 = vrot.slane %v62_v33, 6  ;;  %v82_v37 = vrot.slane %v76_v34, 6 }
  0x21   :  { %v85_v39 = vsel %vm83_vm1, %v69_v35, %v82_v37  ;;  %v84_v41 = vsel %vm83_vm1, %v55_v38, %v81_v36 }
  0x22   :  { %v90_v40 = vrot.slane %v85_v39, 7 }
  0x24   :  { %v92_v42 = vsel %vm91_vm2, %v90_v40, %v84_v41 }
  0x25   :  { %v94_v44 = vsel %vm93_vm3, %v90_v40, %v92_v42 }
  0x26   :  { %v96_v45 = vsel %vm95_vm4, %v90_v40, %v94_v44 }
  0x27   :  { %v98_v46 = vsel %vm97_vm5, %v90_v40, %v96_v45 }
  0x28   :  { %v100_v47 = vadd.f32 %v98_v46, %v34_v43 }
  0x2a   :  { %101 = vst [vmem:[#allocation2] sm:$0xf] %v100_v47 }
  0x31   :  { %v105_v48 = vld [vmem:[#allocation2] sm:$0xf] }
  0x32   :  { %v106_v49 = vmul.f32 0.25, %v105_v48 }
  0x34   :  { %107 = vst [vmem:[#allocation6] sm:$0xf] %v106_v49 }
  0x35   :  { %118 = dma.vmem_to_hbm [thread:$0]  %s114_s13, 64, %s116_s16, [#allocation5]  }
  0x36   :  { %180 = dma.done.wait [#allocation5], 64  }
  0x37   :  { %181 = vsyncadd [#allocation5], 4294967232 }
  0x38   :  { %123 = vsyncpa [#allocation4], 1 }
  0x39   :  { %124 = vsyncpa [#allocation5], 1 }

</bundles_post_ra>
